<compile_context>
chip_gen: v7x
topology: tpu7x:2x2x1
jax: 0.10.0
libtpu: 0.0.40
codegen_flags: <defaults>
</compile_context>

<pallas_src>
import jax
import jax.numpy as jnp
import numpy as np
from jax.experimental import pallas as pl
from jax.experimental.pallas import tpu as pltpu

EPS = 1e-15


def _diag_kernel(dm_ref, eigs_ref, u_ref):
    # dm_ref  : (4, BN)  rows = [d00, d01, d10, d11] of the flattened 2x2
    # eigs_ref: (2, BN)  rows = [e0, e1]
    # u_ref   : (4, BN)  rows = [U00, U01, U10, U11]
    dm = dm_ref[...]                       # (4, BN) f32
    d0 = dm[0:1, :]                        # (1, BN)
    lam = dm[1:2, :]                       # d_mat[:, 0, 1]
    d1 = dm[3:4, :]

    # --- eigenvalues (mirrors torch forward: factored radical) -------------
    rad_e = jnp.sqrt((d0 - d1) ** 2 + 4.0 * lam ** 2 + EPS)
    s = d0 + d1
    eigs_ref[0:1, :] = 0.5 * (s - rad_e)
    eigs_ref[1:2, :] = 0.5 * (s + rad_e)

    # --- eigenvectors (mirrors compute_v: expanded radical) ----------------
    rad_v = jnp.sqrt(d0 * d0 - 2.0 * d0 * d1 + d1 * d1 + 4.0 * lam * lam + EPS)
    inv_denom = 1.0 / (2.0 * lam)          # one divide per lane, reused twice
    term_1 = -d0 + d1
    x_l = -(term_1 + rad_v) * inv_denom    # 'lower'
    x_u = -(term_1 - rad_v) * inv_denom    # 'upper'

    inv_nl = jax.lax.rsqrt(x_l * x_l + 1.0)   # 1/||[x_l, 1]||  (EUP)
    inv_nu = jax.lax.rsqrt(x_u * x_u + 1.0)   # 1/||[x_u, 1]||

    # U = U_inv^T with U_inv rows = [v_lower, v_upper]
    u_ref[0:1, :] = x_l * inv_nl           # U[:, 0, 0]
    u_ref[1:2, :] = x_u * inv_nu           # U[:, 0, 1]
    u_ref[2:3, :] = inv_nl                 # U[:, 1, 0]
    u_ref[3:4, :] = inv_nu                 # U[:, 1, 1]


def diagonalize(d_mat, *, block_n=8192):
    """d_mat: (N, 2, 2) float array.  Returns (eigs (N,2), U (N,2,2))."""
    n = d_mat.shape[0]
    dm = d_mat.reshape(n, 4).astype(jnp.float32)

    # Lane-dense tiling: batch -> lanes.  Block is a multiple of 128 lanes,
    # clamped for small inputs.  8192 lanes x (4 in + 6 out) x f32 x 2 bufs
    # is < 1 MiB: comfortably inside v5e's 16 MiB / v7x's 32 MiB scoped VMEM.
    bn = min(block_n, pl.cdiv(n, 128) * 128)
    bn = pl.cdiv(bn, 128) * 128
    n_padded = pl.cdiv(n, bn) * bn
    pad = n_padded - n
    if pad:
        # Pad with 1.0 so lam != 0 in the tail (keeps padded lanes finite);
        # padded columns are sliced off below.
        dm = jnp.pad(dm, ((0, pad), (0, 0)), constant_values=1.0)
    dm_t = dm.T                            # (4, n_padded), batch on lanes

    grid = (n_padded // bn,)               # keep >=2 blocks on large N so the
                                           # 'parallel' axis shards v7x's 2 TCs
    eigs_t, u_t = pl.pallas_call(
        _diag_kernel,
        out_shape=(
            jax.ShapeDtypeStruct((2, n_padded), jnp.float32),
            jax.ShapeDtypeStruct((4, n_padded), jnp.float32),
        ),
        grid_spec=pltpu.PrefetchScalarGridSpec(
            num_scalar_prefetch=0,
            grid=grid,
            in_specs=[pl.BlockSpec((4, bn), lambda i: (0, i))],
            out_specs=(
                pl.BlockSpec((2, bn), lambda i: (0, i)),
                pl.BlockSpec((4, bn), lambda i: (0, i)),
            ),
        ),
        compiler_params=pltpu.CompilerParams(
            dimension_semantics=("parallel",),
        ),
    )(dm_t)

    eigs = eigs_t[:, :n].T                       # (N, 2)
    U = u_t[:, :n].T.reshape(n, 2, 2)            # (N, 2, 2)
    return eigs, U


def diagonalize_ref(d_mat):
    """Pure-JAX reference mirroring the PyTorch forward exactly."""
    d_mat = d_mat.astype(jnp.float32)
    d0 = d_mat[:, 0, 0]
    d1 = d_mat[:, 1, 1]
    lam = d_mat[:, 0, 1]

    rad = jnp.sqrt((d0 - d1) ** 2 + 4 * lam ** 2 + EPS)
    e0 = 0.5 * (d0 + d1 - rad)
    e1 = 0.5 * (d0 + d1 + rad)
    eigs = jnp.stack([e0, e1], axis=-1)

    term_1 = -d0 + d1
    term_2 = jnp.sqrt(d0 ** 2 - 2 * d0 * d1 + d1 ** 2 + 4 * lam ** 2 + EPS)
    denom = 2 * lam

    def make_v(x):
        v_crude = jnp.stack([x, jnp.ones_like(x)], axis=-1)
        v_norm = jnp.sqrt(jnp.sum(v_crude ** 2, axis=-1, keepdims=True))
        return v_crude / v_norm

    v_lower = make_v(-(term_1 + term_2) / denom)
    v_upper = make_v(-(term_1 - term_2) / denom)
    U_inv = jnp.concatenate([v_lower, v_upper], axis=-1).reshape(-1, 2, 2)
    U = jnp.swapaxes(U_inv, 1, 2)
    return eigs, U


if __name__ == "__main__":
    key = jax.random.PRNGKey(0)
    n = 100  # small batch of 2x2 matrices; non-multiple of 128 to test padding

    # Symmetric 2x2 matrices (only [0,0], [1,1], [0,1] are read by the module).
    vals = jax.random.normal(key, (n, 3), dtype=jnp.float32)
    d0, d1, lam = vals[:, 0], vals[:, 1], vals[:, 2]
    d_mat = jnp.stack(
        [jnp.stack([d0, lam], axis=-1), jnp.stack([lam, d1], axis=-1)],
        axis=-2,
    )  # (n, 2, 2)

    eigs, U = diagonalize(d_mat)
    jax.block_until_ready((eigs, U))

    eigs_ref, U_ref = diagonalize_ref(d_mat)
    np.testing.assert_allclose(np.asarray(eigs), np.asarray(eigs_ref),
                               rtol=1e-5, atol=1e-6)
    np.testing.assert_allclose(np.asarray(U), np.asarray(U_ref),
                               rtol=1e-5, atol=1e-6)
    assert eigs.shape == (n, 2) and U.shape == (n, 2, 2)

    print("KERNEL_OK")
</pallas_src>

<mosaic_0001>
module attributes {stable_mosaic.version = 11 : i64} {
  func.func @_diag_kernel(%arg0: i32, %arg1: memref<4x128xf32, #tpu.memory_space<vmem>>, %arg2: memref<2x128xf32, #tpu.memory_space<vmem>>, %arg3: memref<4x128xf32, #tpu.memory_space<vmem>>) attributes {dimension_semantics = [#tpu.dimension_semantics<parallel>], iteration_bounds = array<i64: 1>, scalar_prefetch = 0 : i64, scratch_operands = 0 : i64, tpu.core_type = #tpu.core_type<tc>, window_params = [{transform_indices = @transform_0, window_bounds = array<i64: 4, 128>}, {transform_indices = @transform_1, window_bounds = array<i64: 2, 128>}, {transform_indices = @transform_2, window_bounds = array<i64: 4, 128>}]} {
    %c0 = arith.constant 0 : index
    %c0_0 = arith.constant 0 : index
    %0 = vector.load %arg1[%c0, %c0_0] : memref<4x128xf32, #tpu.memory_space<vmem>>, vector<4x128xf32>
    %1 = vector.extract_strided_slice %0 {offsets = [0, 0], sizes = [1, 128], strides = [1, 1]} : vector<4x128xf32> to vector<1x128xf32>
    %2 = vector.extract_strided_slice %0 {offsets = [1, 0], sizes = [1, 128], strides = [1, 1]} : vector<4x128xf32> to vector<1x128xf32>
    %3 = vector.extract_strided_slice %0 {offsets = [3, 0], sizes = [1, 128], strides = [1, 1]} : vector<4x128xf32> to vector<1x128xf32>
    %4 = arith.subf %1, %3 : vector<1x128xf32>
    %5 = arith.mulf %4, %4 : vector<1x128xf32>
    %6 = arith.mulf %2, %2 : vector<1x128xf32>
    %cst = arith.constant 4.000000e+00 : f32
    %7 = vector.broadcast %cst : f32 to vector<1x128xf32>
    %8 = arith.mulf %7, %6 : vector<1x128xf32>
    %9 = arith.addf %5, %8 : vector<1x128xf32>
    %cst_1 = arith.constant 1.000000e-15 : f32
    %10 = vector.broadcast %cst_1 : f32 to vector<1x128xf32>
    %11 = arith.addf %9, %10 : vector<1x128xf32>
    %12 = math.sqrt %11 : vector<1x128xf32>
    %13 = arith.addf %1, %3 : vector<1x128xf32>
    %14 = arith.subf %13, %12 : vector<1x128xf32>
    %cst_2 = arith.constant 5.000000e-01 : f32
    %15 = vector.broadcast %cst_2 : f32 to vector<1x128xf32>
    %16 = arith.mulf %15, %14 : vector<1x128xf32>
    %c0_3 = arith.constant 0 : index
    %c0_4 = arith.constant 0 : index
    %17 = vector.load %arg2[%c0_3, %c0_4] : memref<2x128xf32, #tpu.memory_space<vmem>>, vector<1x128xf32>
    tpu.vector_store %arg2[%c0_3, %c0_4], %16 {strides = array<i32>} : memref<2x128xf32, #tpu.memory_space<vmem>>, vector<1x128xf32>,
    %18 = arith.addf %13, %12 : vector<1x128xf32>
    %cst_5 = arith.constant 5.000000e-01 : f32
    %19 = vector.broadcast %cst_5 : f32 to vector<1x128xf32>
    %20 = arith.mulf %19, %18 : vector<1x128xf32>
    %c1 = arith.constant 1 : index
    %c0_6 = arith.constant 0 : index
    %21 = vector.load %arg2[%c1, %c0_6] : memref<2x128xf32, #tpu.memory_space<vmem>>, vector<1x128xf32>
    tpu.vector_store %arg2[%c1, %c0_6], %20 {strides = array<i32>} : memref<2x128xf32, #tpu.memory_space<vmem>>, vector<1x128xf32>,
    %22 = arith.mulf %1, %1 : vector<1x128xf32>
    %cst_7 = arith.constant 2.000000e+00 : f32
    %23 = vector.broadcast %cst_7 : f32 to vector<1x128xf32>
    %24 = arith.mulf %23, %1 : vector<1x128xf32>
    %25 = arith.mulf %24, %3 : vector<1x128xf32>
    %26 = arith.subf %22, %25 : vector<1x128xf32>
    %27 = arith.mulf %3, %3 : vector<1x128xf32>
    %28 = arith.addf %26, %27 : vector<1x128xf32>
    %cst_8 = arith.constant 4.000000e+00 : f32
    %29 = vector.broadcast %cst_8 : f32 to vector<1x128xf32>
    %30 = arith.mulf %29, %2 : vector<1x128xf32>
    %31 = arith.mulf %30, %2 : vector<1x128xf32>
    %32 = arith.addf %28, %31 : vector<1x128xf32>
    %cst_9 = arith.constant 1.000000e-15 : f32
    %33 = vector.broadcast %cst_9 : f32 to vector<1x128xf32>
    %34 = arith.addf %32, %33 : vector<1x128xf32>
    %35 = math.sqrt %34 : vector<1x128xf32>
    %cst_10 = arith.constant 2.000000e+00 : f32
    %36 = vector.broadcast %cst_10 : f32 to vector<1x128xf32>
    %37 = arith.mulf %36, %2 : vector<1x128xf32>
    %cst_11 = arith.constant 1.000000e+00 : f32
    %38 = vector.broadcast %cst_11 : f32 to vector<1x128xf32>
    %39 = arith.divf %38, %37 : vector<1x128xf32>
    %cst_12 = arith.constant 0.000000e+00 : f32
    %40 = vector.broadcast %cst_12 : f32 to vector<1x128xf32>
    %41 = arith.subf %40, %1 : vector<1x128xf32>
    %42 = arith.addf %41, %3 : vector<1x128xf32>
    %43 = arith.addf %42, %35 : vector<1x128xf32>
    %cst_13 = arith.constant 0.000000e+00 : f32
    %44 = vector.broadcast %cst_13 : f32 to vector<1x128xf32>
    %45 = arith.subf %44, %43 : vector<1x128xf32>
    %46 = arith.mulf %45, %39 : vector<1x128xf32>
    %47 = arith.subf %42, %35 : vector<1x128xf32>
    %cst_14 = arith.constant 0.000000e+00 : f32
    %48 = vector.broadcast %cst_14 : f32 to vector<1x128xf32>
    %49 = arith.subf %48, %47 : vector<1x128xf32>
    %50 = arith.mulf %49, %39 : vector<1x128xf32>
    %51 = arith.mulf %46, %46 : vector<1x128xf32>
    %cst_15 = arith.constant 1.000000e+00 : f32
    %52 = vector.broadcast %cst_15 : f32 to vector<1x128xf32>
    %53 = arith.addf %51, %52 : vector<1x128xf32>
    %54 = math.rsqrt %53 : vector<1x128xf32>
    %55 = arith.mulf %50, %50 : vector<1x128xf32>
    %cst_16 = arith.constant 1.000000e+00 : f32
    %56 = vector.broadcast %cst_16 : f32 to vector<1x128xf32>
    %57 = arith.addf %55, %56 : vector<1x128xf32>
    %58 = math.rsqrt %57 : vector<1x128xf32>
    %59 = arith.mulf %46, %54 : vector<1x128xf32>
    %c0_17 = arith.constant 0 : index
    %c0_18 = arith.constant 0 : index
    %60 = vector.load %arg3[%c0_17, %c0_18] : memref<4x128xf32, #tpu.memory_space<vmem>>, vector<1x128xf32>
    tpu.vector_store %arg3[%c0_17, %c0_18], %59 {strides = array<i32>} : memref<4x128xf32, #tpu.memory_space<vmem>>, vector<1x128xf32>,
    %61 = arith.mulf %50, %58 : vector<1x128xf32>
    %c1_19 = arith.constant 1 : index
    %c0_20 = arith.constant 0 : index
    %62 = vector.load %arg3[%c1_19, %c0_20] : memref<4x128xf32, #tpu.memory_space<vmem>>, vector<1x128xf32>
    tpu.vector_store %arg3[%c1_19, %c0_20], %61 {strides = array<i32>} : memref<4x128xf32, #tpu.memory_space<vmem>>, vector<1x128xf32>,
    %c2 = arith.constant 2 : index
    %c0_21 = arith.constant 0 : index
    %63 = vector.load %arg3[%c2, %c0_21] : memref<4x128xf32, #tpu.memory_space<vmem>>, vector<1x128xf32>
    tpu.vector_store %arg3[%c2, %c0_21], %54 {strides = array<i32>} : memref<4x128xf32, #tpu.memory_space<vmem>>, vector<1x128xf32>,
    %c3 = arith.constant 3 : index
    %c0_22 = arith.constant 0 : index
    %64 = vector.load %arg3[%c3, %c0_22] : memref<4x128xf32, #tpu.memory_space<vmem>>, vector<1x128xf32>
    tpu.vector_store %arg3[%c3, %c0_22], %58 {strides = array<i32>} : memref<4x128xf32, #tpu.memory_space<vmem>>, vector<1x128xf32>,
    return
  }
  func.func @transform_0(%arg0: i32) -> (i32, i32) {
    %c0_i32 = arith.constant 0 : i32
    %c0_i32_0 = arith.constant 0 : i32
    return %c0_i32, %arg0 : i32, i32
  }
  func.func @transform_1(%arg0: i32) -> (i32, i32) {
    %c0_i32 = arith.constant 0 : i32
    %c0_i32_0 = arith.constant 0 : i32
    return %c0_i32, %arg0 : i32, i32
  }
  func.func @transform_2(%arg0: i32) -> (i32, i32) {
    %c0_i32 = arith.constant 0 : i32
    %c0_i32_0 = arith.constant 0 : i32
    return %c0_i32, %arg0 : i32, i32
  }
}

</mosaic_0001>

<bundles_post_ra>
// kernel: tpu_custom_call.1
= control target key start
LH: loop header
LB: loop body
LE: loop exit
PB: predicated region body
PF: predicated region fallthrough
CT: control target
= control target key end

     0   :  { %8 = vsyncpa [#allocation3], 0  ;;  %s265_s0 = inlined_call_operand.hbm [shape: f32[4,128], index: 0, kind: input, shape index: {}]   ;;  %s266_s1 = inlined_call_operand.hbm [shape: f32[2,128], index: 1, kind: output, shape index: {0}]   ;;  %s267_s2 = inlined_call_operand.hbm [shape: f32[4,128], index: 2, kind: output, shape index: {1}]  }
   0x1   :  { %9 = vsyncpa [#allocation4], 0 }
   0x2   :  { %10 = vsyncpa [#allocation7], 0  ;;  %s211_s9 = smov [#allocation2]   ;;  %s139_s13 = scalar_lea.hbm %s265_s0, 64 }
   0x3   :  { %s17_s10 = sshll.u32 %s211_s9, 4  ;;  %p140_p0 = scmp.ne.s32.totalorder %s265_s0, %s139_s13  ;;  %s18_s10 = int_to_ptr.vmem [resolvable:$true] %s17_s10 }
   0x4   :  { %p143_p1 = scmp.lt.u32.totalorder %s139_s13, %s265_s0 }
   0x6   :  { %p145_p2 = pnand %p143_p1, %p140_p0 }
   0x8   :  { %148 = shalt.err (!%p145_p2)
}
   0x9   :  { %s149_s18 = scalar_lea.vmem %s18_s10, 64  ;;  %p154_p4 = scmp.lt.s32.totalorder %s18_s10, %s18_s10 }
   0xa   :  { %p150_p3 = scmp.ne.s32.totalorder %s18_s10, %s149_s18  ;;  %p155_p5 = scmp.lt.s32.totalorder %s149_s18, %s149_s18 }
   0xc   :  { %p156_p6 = por %p155_p5, %p154_p4 }
   0xe   :  { %p157_p7 = pnand %p156_p6, %p150_p3 }
  0x10   :  { %160 = shalt.err (!%p157_p7)
}
  0x11   :  { %20 = dma.hbm_to_vmem [thread:$0]  %s265_s0, 64, %s18_s10, [#allocation3]  }
  0x12   :  { %205 = dma.done.wait [#allocation3], 64  }
  0x13   :  { %206 = vsyncadd [#allocation3], 4294967232  ;;  %v24_v0 = vld [vmem:[#allocation2] sm:$0xf]  ;;  %s212_s0 = smov [#allocation5]  }
  0x14   :  { %v26_v1 = vrot.slane %v24_v0, 3  ;;  %v30_v2 = vmul.f32 %v24_v0, %v24_v0  ;;  %v51_v3 = vmul.f32 2.0, %v24_v0  ;;  %v58_v4 = vmul.f32 4.0, %v24_v0  ;;  %s103_s21 = sshll.u32 %s212_s0, 4  ;;  %s104_s21 = int_to_ptr.vmem [resolvable:$true] %s103_s21 }
  0x15   :  { %v74_v21 = vsub.f32 0.0, %v24_v0  ;;  %s161_s22 = scalar_lea.vmem %s104_s21, 32  ;;  %p166_p9 = scmp.lt.s32.totalorder %s104_s21, %s104_s21 }
  0x16   :  { %v28_v5 = vsub.f32 %v24_v0, %v26_v1  ;;  %v31_v6 = vmul.f32 4.0, %v30_v2  ;;  %v52_v7 = vmul.f32 %v51_v3, %v26_v1  ;;  %v55_v8 = vrot.slane %v30_v2, 3  ;;  %p162_p8 = scmp.ne.s32.totalorder %s104_s21, %s161_s22  ;;  %p167_p10 = scmp.lt.s32.totalorder %s161_s22, %s161_s22 }
  0x17   :  { %v59_v9 = vmul.f32 %v58_v4, %v24_v0  ;;  %v44_v23 = vadd.f32 %v26_v1, %v24_v0  ;;  %v75_v29 = vadd.f32 %v74_v21, %v26_v1 }
  0x18   :  { %v29_v10 = vmul.f32 %v28_v5, %v28_v5  ;;  %v33_v11 = vrot.slane %v31_v6, 1  ;;  %v53_v12 = vsub.f32 %v30_v2, %v52_v7  ;;  %p168_p11 = por %p167_p10, %p166_p9 }
  0x19   :  { %v61_v13 = vrot.slane %v59_v9, 1 }
  0x1a   :  { %v35_v14 = vadd.f32 %v33_v11, %v29_v10  ;;  %v57_v15 = vadd.f32 %v55_v8, %v53_v12  ;;  %p169_p12 = pnand %p168_p11, %p162_p8 }
  0x1c   :  { %v36_v16 = vadd.f32 1e-15, %v35_v14  ;;  %v63_v17 = vadd.f32 %v61_v13, %v57_v15 }
  0x1e   :  { %129 = vrsqrt.f32 %v36_v16  ;;  %v64_v18 = vadd.f32 1e-15, %v63_v17  ;;  %vm39_vm0 = vcmp.eq.f32.partialorder %v36_v16, inf  ;;  %v42_v20 = vand.u32 2147483648, %v36_v16 }
  0x1f   :  { %vm41_vm1 = vcmp.eq.f32.partialorder %v36_v16, 0.0 }
  0x20   :  { %131 = vrsqrt.f32 %v64_v18  ;;  %vm67_vm2 = vcmp.eq.f32.partialorder %v64_v18, inf  ;;  %v70_v26 = vand.u32 2147483648, %v64_v18  ;;  %vm69_vm3 = vcmp.eq.f32.partialorder %v64_v18, 0.0 }
  0x21   :  { %133 = vrcp.f32 %v51_v3 }
  0x28   :  { %v130_v19 = vpop.eup %129 }
  0x29   :  { %v38_v22 = vmul.f32 %v130_v19, %v36_v16 }
  0x2a   :  { %v132_v24 = vpop.eup %131 }
  0x2b   :  { %v40_v25 = vsel %vm39_vm0, %v36_v16, %v38_v22  ;;  %v66_v28 = vmul.f32 %v132_v24, %v64_v18  ;;  %v134_v30 = vpop.eup %133 }
  0x2c   :  { %v43_v27 = vsel %vm41_vm1, %v42_v20, %v40_v25  ;;  %v79_v38 = vrot.slane %v134_v30, 1 }
  0x2d   :  { %v45_v31 = vsub.f32 %v44_v23, %v43_v27  ;;  %v48_v32 = vadd.f32 %v44_v23, %v43_v27  ;;  %v68_v33 = vsel %vm67_vm2, %v64_v18, %v66_v28 }
  0x2e   :  { %v71_v36 = vsel %vm69_vm3, %v70_v26, %v68_v33 }
  0x2f   :  { %v46_v34 = vmul.f32 0.5, %v45_v31  ;;  %v49_v35 = vmul.f32 0.5, %v48_v32  ;;  %v76_v37 = vadd.f32 %v75_v29, %v71_v36  ;;  %v82_v39 = vsub.f32 %v75_v29, %v71_v36 }
  0x31   :  { %47 = vst [vmem:[#allocation5] sm:$0x1] %v46_v34  ;;  %50 = vst [vmem:[#allocation5 + $0x1] sm:$0x1] %v49_v35  ;;  %v77_v40 = vsub.f32 0.0, %v76_v37  ;;  %v83_v41 = vsub.f32 0.0, %v82_v39 }
  0x32   :  { %172 = shalt.err (!%p169_p12)
}
  0x33   :  { %s173_s25 = scalar_lea.hbm %s266_s1, 32 }
  0x34   :  { %p174_p13 = scmp.ne.s32.totalorder %s266_s1, %s173_s25  ;;  %p177_p0 = scmp.lt.u32.totalorder %s173_s25, %s266_s1 }
  0x36   :  { %p179_p1 = pnand %p177_p0, %p174_p13 }
  0x38   :  { %182 = shalt.err (!%p179_p1)
}
  0x39   :  { %106 = dma.vmem_to_hbm [thread:$0]  %s104_s21, 32, %s266_s1, [#allocation4]   ;;  %v81_v42 = vmul.f32 %v79_v38, %v77_v40  ;;  %v84_v43 = vmul.f32 %v83_v41, %v79_v38 }
  0x3a   :  { %s213_s4 = smov [#allocation6]  }
  0x3b   :  { %v85_v44 = vmul.f32 %v81_v42, %v81_v42  ;;  %v88_v45 = vmul.f32 %v84_v43, %v84_v43  ;;  %s113_s5 = sshll.u32 %s213_s4, 4  ;;  %s114_s5 = int_to_ptr.vmem [resolvable:$true] %s113_s5 }
  0x3c   :  { %s183_s1 = scalar_lea.vmem %s114_s5, 64  ;;  %p188_p3 = scmp.lt.s32.totalorder %s114_s5, %s114_s5 }
  0x3d   :  { %v86_v46 = vadd.f32 1.0, %v85_v44  ;;  %v89_v47 = vadd.f32 1.0, %v88_v45  ;;  %p184_p2 = scmp.ne.s32.totalorder %s114_s5, %s183_s1  ;;  %p189_p4 = scmp.lt.s32.totalorder %s183_s1, %s183_s1 }
  0x3f   :  { %135 = vrsqrt.f32 %v86_v46  ;;  %p190_p5 = por %p189_p4, %p188_p3 }
  0x40   :  { %137 = vrsqrt.f32 %v89_v47 }
  0x41   :  { %p191_p6 = pnand %p190_p5, %p184_p2 }
  0x49   :  { %v136_v48 = vpop.eup %135 }
  0x4a   :  { %v138_v49 = vpop.eup %137  ;;  %v91_v50 = vmul.f32 %v136_v48, %v81_v42  ;;  %95 = vst [vmem:[#allocation6 + $0x2] sm:$0x1] %v136_v48 }
  0x4b   :  { %v93_v51 = vmul.f32 %v138_v49, %v84_v43  ;;  %96 = vst [vmem:[#allocation6 + $0x3] sm:$0x1] %v138_v49 }
  0x4c   :  { %92 = vst [vmem:[#allocation6] sm:$0x1] %v91_v50 }
  0x4d   :  { %94 = vst [vmem:[#allocation6 + $0x1] sm:$0x1] %v93_v51 }
  0x4e   :  { %194 = shalt.err (!%p191_p6)
}
  0x4f   :  { %s195_s8 = scalar_lea.hbm %s267_s2, 64 }
  0x50   :  { %p196_p7 = scmp.ne.s32.totalorder %s267_s2, %s195_s8  ;;  %p199_p8 = scmp.lt.u32.totalorder %s195_s8, %s267_s2 }
  0x52   :  { %p201_p9 = pnand %p199_p8, %p196_p7 }
  0x54   :  { %204 = shalt.err (!%p201_p9)
}
  0x55   :  { %116 = dma.vmem_to_hbm [thread:$0]  %s114_s5, 64, %s267_s2, [#allocation7]  }
  0x56   :  { %207 = dma.done.wait [#allocation4], 32  }
  0x57   :  { %208 = vsyncadd [#allocation4], 4294967264 }
  0x58   :  { %209 = dma.done.wait [#allocation7], 64  }
  0x59   :  { %210 = vsyncadd [#allocation7], 4294967232 }
  0x5a   :  { %123 = vsyncpa [#allocation3], 1 }
  0x5b   :  { %124 = vsyncpa [#allocation4], 1 }
  0x5c   :  { %125 = vsyncpa [#allocation7], 1 }

</bundles_post_ra>
